<compile_context>
chip_gen: v7x
topology: tpu7x:2x2x1
jax: 0.10.0
libtpu: 0.0.40
codegen_flags: <defaults>
</compile_context>

<pallas_src>
import functools

import jax
import jax.numpy as jnp
from jax import lax
from jax.experimental import pallas as pl
from jax.experimental.pallas import tpu as pltpu


def _round_up(x, m):
    return (x + m - 1) // m * m


def _euler_kernel(x_ref, wt_ref, b_ref, o_ref, *, h, n_steps, unroll):
    """x_ref : (TB, Hp) f32 VMEM state tile (padded).
    wt_ref: (Hp, Hp) f32 or bf16 VMEM, W^T (padded, resident across all steps).
    b_ref : (1, Hp)  f32 VMEM bias row (padded).
    o_ref : (TB, Hp) f32 VMEM output tile (HBM buffer aliased with x's).
    h is a baked-in Python float (Euler step size).
    """
    wt = wt_ref[...]                      # resident weight (bf16 or f32)
    bias = b_ref[...]                     # (1, Hp); broadcast happens inside the add
                                          # (stride-0 load, no (TB, Hp) buffer kept live)

    def step(_, x):
        # Linear(x) = x @ W^T + b   (torch.nn.Linear convention).
        # MXU inputs in wt's dtype, f32 accumulation; all elementwise work stays f32.
        y = jnp.dot(x.astype(wt.dtype), wt,
                    preferred_element_type=jnp.float32) + bias
        # NOTE: for Hp <~ 256 the single EUP doing tanh is the saturated slot, not the
        # MXU; a VPU polynomial tanh would help there, but jnp.tanh is kept to match
        # torch.nn.Tanh semantics exactly.
        return x + h * jnp.tanh(y)        # tanh -> EUP, axpy -> VPU

    o_ref[...] = lax.fori_loop(0, n_steps, step, x_ref[...], unroll=unroll)


def euler_forward(x0, w, b, t0, t1, n_steps, *, use_bf16_weights=None):
    """x0: (B, H) f32, w: (H, H) f32 (torch Linear weight, out x in), b: (H,) f32.

    use_bf16_weights: None -> auto (f32 when it fits the VMEM budget; bf16 otherwise,
    or on v5-family where the MXU has no native f32 path).  True/False forces a path.
    """
    B, H = x0.shape
    assert w.shape == (H, H) and b.shape == (H,)
    n_steps = int(n_steps)

    # ---- generation detection (tile shape + VMEM budget) -----------------------------
    kind = getattr(jax.devices()[0], "device_kind", "").lower()
    is_v7 = "v7" in kind
    is_v5 = "v5" in kind
    tb_max = 128 if is_v5 else 256           # v5 MXUs are 128x128; v6e/v7x are 2x256
    min_tiles = 2 if is_v7 else 1            # v7x: 2 TensorCores -> want >=2 grid tiles
    phys_vmem = (64 << 20) if is_v7 else (128 << 20)
    vmem_clamp = (56 << 20) if is_v7 else (100 << 20)

    # ---- lane/sublane-dense padding & batch tiling (exact, see header) ---------------
    Hp = _round_up(H, 128)
    if B <= tb_max:
        if min_tiles > 1 and B >= 8 * min_tiles:
            TB = _round_up(pl.cdiv(B, min_tiles), 8)   # split so both TCs get a tile
        else:
            TB = _round_up(B, 8)
    else:
        TB = tb_max                                     # fill the MXU M dim
    Bp = _round_up(B, TB)

    # ---- weight dtype gating + explicit VMEM accounting -------------------------------
    budget = int(phys_vmem * 0.85)
    tile_bytes = TB * Hp * 4
    # Buffered(1) weight/bias (single copy) + double-buffered x-in and out tiles.
    fixed = Hp * 4 + 4 * tile_bytes
    if use_bf16_weights is None:
        f32_fits = fixed + Hp * Hp * 4 <= budget
        use_bf16_weights = (not f32_fits) or is_v5
    w_dtype = jnp.bfloat16 if use_bf16_weights else jnp.float32
    w_bytes = Hp * Hp * (2 if use_bf16_weights else 4)
    need = fixed + w_bytes
    vmem_limit = int(min(vmem_clamp, max(int(need * 1.25), 16 << 20)))
    # TODO(synk): for Hp too large to keep W^T resident even in bf16 (>~5k on v7x),
    # stream W column panels from HBM (memory_space=pl.ANY + manual double-buffered
    # make_async_copy inside step()); not implemented here.

    x_pad = jnp.pad(jnp.asarray(x0, jnp.float32), ((0, Bp - B), (0, Hp - H)))
    wt_pad = jnp.pad(jnp.asarray(w, jnp.float32).T,
                     ((0, Hp - H), (0, Hp - H))).astype(w_dtype)
    b_pad = jnp.pad(jnp.asarray(b, jnp.float32), (0, Hp - H)).reshape(1, Hp)
    h = (float(t1) - float(t0)) / float(n_steps)        # baked in (no SMEM operand)

    # Adaptive unroll: small tiles are a latency-bound serial chain (full unroll lets
    # the LLO scheduler overlap steps); big tiles already saturate MXU/EUP per step.
    if TB * Hp <= 32 * 1024:
        unroll = min(n_steps, 32)
    elif TB * Hp <= 256 * 1024:
        unroll = min(n_steps, 4)
    else:
        unroll = min(n_steps, 2)

    kernel = functools.partial(_euler_kernel, h=h, n_steps=n_steps, unroll=unroll)

    cost = pl.CostEstimate(
        flops=2 * n_steps * Bp * Hp * Hp,
        transcendentals=n_steps * Bp * Hp,
        bytes_accessed=2 * Bp * Hp * 4 + w_bytes + Hp * 4,
    )

    out_pad = pl.pallas_call(
        kernel,
        out_shape=jax.ShapeDtypeStruct((Bp, Hp), jnp.float32),
        grid=(Bp // TB,),
        in_specs=[
            pl.BlockSpec((TB, Hp), lambda i: (i, 0)),                   # x tile
            pl.BlockSpec((Hp, Hp), lambda i: (0, 0),
                         pipeline_mode=pl.Buffered(1)),                 # W^T: DMA once
            pl.BlockSpec((1, Hp), lambda i: (0, 0),
                         pipeline_mode=pl.Buffered(1)),                 # bias: DMA once
        ],
        out_specs=pl.BlockSpec((TB, Hp), lambda i: (i, 0)),
        input_output_aliases={0: 0},                                    # reuse x's HBM
        compiler_params=pltpu.CompilerParams(
            dimension_semantics=("parallel",),                          # shard tiles over TCs
            vmem_limit_bytes=vmem_limit,
        ),
        cost_estimate=cost,
    )(x_pad, wt_pad, b_pad)

    return out_pad[:B, :H]


def euler_forward_ref(x0, w, b, t0, t1, n_steps):
    """Pure-JAX reference mirroring the PyTorch module (f32 throughout)."""
    h = (t1 - t0) / n_steps
    x = jnp.asarray(x0, jnp.float32)
    wf = jnp.asarray(w, jnp.float32)
    bf = jnp.asarray(b, jnp.float32)
    for _ in range(n_steps):
        x = x + h * jnp.tanh(x @ wf.T + bf)
    return x


if __name__ == "__main__":
    # Small shapes consistent with the module: hidden_layer_size=32, batch=2, N=8.
    batch, hidden, N = 2, 32, 8
    t0, t1 = 0.0, 1.0

    key = jax.random.PRNGKey(0)
    kx, kw, kb = jax.random.split(key, 3)
    x0 = jax.random.normal(kx, (batch, hidden), dtype=jnp.float32)
    # Deterministic Linear(hidden, hidden) parameters (synthetic, no checkpoint load).
    w = jax.random.normal(kw, (hidden, hidden), dtype=jnp.float32) * (1.0 / jnp.sqrt(hidden))
    b = jax.random.normal(kb, (hidden,), dtype=jnp.float32) * 0.1

    # TODO(synk): `observer` hook (side-effecting append of intermediate states) has no
    # clean Pallas equivalent; observer_flag defaults to False so forward is unaffected.

    ref = euler_forward_ref(x0, w, b, t0, t1, N)

    # Exact path (f32 weights) — tight tolerance vs reference.
    out_f32 = jax.block_until_ready(
        euler_forward(x0, w, b, t0, t1, N, use_bf16_weights=False))
    assert jnp.allclose(out_f32, ref, atol=1e-4, rtol=1e-4), "f32 path mismatch vs reference"

    # Fast path (bf16 MXU weights, f32 accumulation/state) — looser tolerance since
    # bf16 rounding compounds over the N Euler steps.
    out_bf16 = jax.block_until_ready(
        euler_forward(x0, w, b, t0, t1, N, use_bf16_weights=True))
    assert jnp.allclose(out_bf16, ref, atol=2e-2, rtol=2e-2), "bf16 path mismatch vs reference"

    # Auto path (size/generation-gated weight dtype).
    out_auto = jax.block_until_ready(euler_forward(x0, w, b, t0, t1, N))
    assert jnp.allclose(out_auto, ref, atol=2e-2, rtol=2e-2), "auto path mismatch vs reference"

    print("KERNEL_OK")
</pallas_src>

<mosaic_0001>
module attributes {stable_mosaic.version = 11 : i64} {
  func.func @_euler_kernel(%arg0: i32, %arg1: memref<8x128xf32, #tpu.memory_space<vmem>>, %arg2: memref<128x128xf32, #tpu.memory_space<vmem>>, %arg3: memref<1x128xf32, #tpu.memory_space<vmem>>, %arg4: memref<8x128xf32, #tpu.memory_space<vmem>>) attributes {dimension_semantics = [#tpu.dimension_semantics<parallel>], iteration_bounds = array<i64: 1>, scalar_prefetch = 0 : i64, scratch_operands = 0 : i64, tpu.core_type = #tpu.core_type<tc>, window_params = [{transform_indices = @transform_0, window_bounds = array<i64: 8, 128>}, {pipeline_mode = #tpu.pipeline_mode<synchronous>, transform_indices = @transform_1, window_bounds = array<i64: 128, 128>}, {pipeline_mode = #tpu.pipeline_mode<synchronous>, transform_indices = @transform_2, window_bounds = array<i64: 1, 128>}, {transform_indices = @transform_3, window_bounds = array<i64: 8, 128>}]} {
    %c0 = arith.constant 0 : index
    %c0_0 = arith.constant 0 : index
    %0 = vector.load %arg2[%c0, %c0_0] : memref<128x128xf32, #tpu.memory_space<vmem>>, vector<128x128xf32>
    %c0_1 = arith.constant 0 : index
    %c0_2 = arith.constant 0 : index
    %1 = vector.load %arg3[%c0_1, %c0_2] : memref<1x128xf32, #tpu.memory_space<vmem>>, vector<1x128xf32>
    %c0_3 = arith.constant 0 : index
    %c0_4 = arith.constant 0 : index
    %2 = vector.load %arg1[%c0_3, %c0_4] : memref<8x128xf32, #tpu.memory_space<vmem>>, vector<8x128xf32>
    %c0_i32 = arith.constant 0 : i32
    %cst = arith.constant dense<0.000000e+00> : vector<8x128xf32>
    %3 = tpu.matmul %2, %0, %cst {dimension_numbers = #tpu.dot_dimension_numbers<[1], [0], [0], [1], [0, 0, 1, 1], [], []>} : vector<8x128xf32>, vector<128x128xf32>, vector<8x128xf32> -> vector<8x128xf32>
    %4 = vector.broadcast %1 : vector<1x128xf32> to vector<8x128xf32>
    %5 = arith.addf %3, %4 : vector<8x128xf32>
    %6 = math.tanh %5 : vector<8x128xf32>
    %cst_5 = arith.constant 1.250000e-01 : f32
    %7 = vector.broadcast %cst_5 : f32 to vector<8x128xf32>
    %8 = arith.mulf %7, %6 : vector<8x128xf32>
    %9 = arith.addf %2, %8 : vector<8x128xf32>
    %c1_i32 = arith.constant 1 : i32
    %cst_6 = arith.constant dense<0.000000e+00> : vector<8x128xf32>
    %10 = tpu.matmul %9, %0, %cst_6 {dimension_numbers = #tpu.dot_dimension_numbers<[1], [0], [0], [1], [0, 0, 1, 1], [], []>} : vector<8x128xf32>, vector<128x128xf32>, vector<8x128xf32> -> vector<8x128xf32>
    %11 = vector.broadcast %1 : vector<1x128xf32> to vector<8x128xf32>
    %12 = arith.addf %10, %11 : vector<8x128xf32>
    %13 = math.tanh %12 : vector<8x128xf32>
    %cst_7 = arith.constant 1.250000e-01 : f32
    %14 = vector.broadcast %cst_7 : f32 to vector<8x128xf32>
    %15 = arith.mulf %14, %13 : vector<8x128xf32>
    %16 = arith.addf %9, %15 : vector<8x128xf32>
    %c2_i32 = arith.constant 2 : i32
    %cst_8 = arith.constant dense<0.000000e+00> : vector<8x128xf32>
    %17 = tpu.matmul %16, %0, %cst_8 {dimension_numbers = #tpu.dot_dimension_numbers<[1], [0], [0], [1], [0, 0, 1, 1], [], []>} : vector<8x128xf32>, vector<128x128xf32>, vector<8x128xf32> -> vector<8x128xf32>
    %18 = vector.broadcast %1 : vector<1x128xf32> to vector<8x128xf32>
    %19 = arith.addf %17, %18 : vector<8x128xf32>
    %20 = math.tanh %19 : vector<8x128xf32>
    %cst_9 = arith.constant 1.250000e-01 : f32
    %21 = vector.broadcast %cst_9 : f32 to vector<8x128xf32>
    %22 = arith.mulf %21, %20 : vector<8x128xf32>
    %23 = arith.addf %16, %22 : vector<8x128xf32>
    %c3_i32 = arith.constant 3 : i32
    %cst_10 = arith.constant dense<0.000000e+00> : vector<8x128xf32>
    %24 = tpu.matmul %23, %0, %cst_10 {dimension_numbers = #tpu.dot_dimension_numbers<[1], [0], [0], [1], [0, 0, 1, 1], [], []>} : vector<8x128xf32>, vector<128x128xf32>, vector<8x128xf32> -> vector<8x128xf32>
    %25 = vector.broadcast %1 : vector<1x128xf32> to vector<8x128xf32>
    %26 = arith.addf %24, %25 : vector<8x128xf32>
    %27 = math.tanh %26 : vector<8x128xf32>
    %cst_11 = arith.constant 1.250000e-01 : f32
    %28 = vector.broadcast %cst_11 : f32 to vector<8x128xf32>
    %29 = arith.mulf %28, %27 : vector<8x128xf32>
    %30 = arith.addf %23, %29 : vector<8x128xf32>
    %c4_i32 = arith.constant 4 : i32
    %cst_12 = arith.constant dense<0.000000e+00> : vector<8x128xf32>
    %31 = tpu.matmul %30, %0, %cst_12 {dimension_numbers = #tpu.dot_dimension_numbers<[1], [0], [0], [1], [0, 0, 1, 1], [], []>} : vector<8x128xf32>, vector<128x128xf32>, vector<8x128xf32> -> vector<8x128xf32>
    %32 = vector.broadcast %1 : vector<1x128xf32> to vector<8x128xf32>
    %33 = arith.addf %31, %32 : vector<8x128xf32>
    %34 = math.tanh %33 : vector<8x128xf32>
    %cst_13 = arith.constant 1.250000e-01 : f32
    %35 = vector.broadcast %cst_13 : f32 to vector<8x128xf32>
    %36 = arith.mulf %35, %34 : vector<8x128xf32>
    %37 = arith.addf %30, %36 : vector<8x128xf32>
    %c5_i32 = arith.constant 5 : i32
    %cst_14 = arith.constant dense<0.000000e+00> : vector<8x128xf32>
    %38 = tpu.matmul %37, %0, %cst_14 {dimension_numbers = #tpu.dot_dimension_numbers<[1], [0], [0], [1], [0, 0, 1, 1], [], []>} : vector<8x128xf32>, vector<128x128xf32>, vector<8x128xf32> -> vector<8x128xf32>
    %39 = vector.broadcast %1 : vector<1x128xf32> to vector<8x128xf32>
    %40 = arith.addf %38, %39 : vector<8x128xf32>
    %41 = math.tanh %40 : vector<8x128xf32>
    %cst_15 = arith.constant 1.250000e-01 : f32
    %42 = vector.broadcast %cst_15 : f32 to vector<8x128xf32>
    %43 = arith.mulf %42, %41 : vector<8x128xf32>
    %44 = arith.addf %37, %43 : vector<8x128xf32>
    %c6_i32 = arith.constant 6 : i32
    %cst_16 = arith.constant dense<0.000000e+00> : vector<8x128xf32>
    %45 = tpu.matmul %44, %0, %cst_16 {dimension_numbers = #tpu.dot_dimension_numbers<[1], [0], [0], [1], [0, 0, 1, 1], [], []>} : vector<8x128xf32>, vector<128x128xf32>, vector<8x128xf32> -> vector<8x128xf32>
    %46 = vector.broadcast %1 : vector<1x128xf32> to vector<8x128xf32>
    %47 = arith.addf %45, %46 : vector<8x128xf32>
    %48 = math.tanh %47 : vector<8x128xf32>
    %cst_17 = arith.constant 1.250000e-01 : f32
    %49 = vector.broadcast %cst_17 : f32 to vector<8x128xf32>
    %50 = arith.mulf %49, %48 : vector<8x128xf32>
    %51 = arith.addf %44, %50 : vector<8x128xf32>
    %c7_i32 = arith.constant 7 : i32
    %cst_18 = arith.constant dense<0.000000e+00> : vector<8x128xf32>
    %52 = tpu.matmul %51, %0, %cst_18 {dimension_numbers = #tpu.dot_dimension_numbers<[1], [0], [0], [1], [0, 0, 1, 1], [], []>} : vector<8x128xf32>, vector<128x128xf32>, vector<8x128xf32> -> vector<8x128xf32>
    %53 = vector.broadcast %1 : vector<1x128xf32> to vector<8x128xf32>
    %54 = arith.addf %52, %53 : vector<8x128xf32>
    %55 = math.tanh %54 : vector<8x128xf32>
    %cst_19 = arith.constant 1.250000e-01 : f32
    %56 = vector.broadcast %cst_19 : f32 to vector<8x128xf32>
    %57 = arith.mulf %56, %55 : vector<8x128xf32>
    %58 = arith.addf %51, %57 : vector<8x128xf32>
    %c0_20 = arith.constant 0 : index
    %c0_21 = arith.constant 0 : index
    %59 = vector.load %arg4[%c0_20, %c0_21] : memref<8x128xf32, #tpu.memory_space<vmem>>, vector<8x128xf32>
    tpu.vector_store %arg4[%c0_20, %c0_21], %58 {strides = array<i32>} : memref<8x128xf32, #tpu.memory_space<vmem>>, vector<8x128xf32>,
    return
  }
  func.func @transform_0(%arg0: i32) -> (i32, i32) {
    %c0_i32 = arith.constant 0 : i32
    %c0_i32_0 = arith.constant 0 : i32
    return %arg0, %c0_i32 : i32, i32
  }
  func.func @transform_1(%arg0: i32) -> (i32, i32) {
    %c0_i32 = arith.constant 0 : i32
    %c0_i32_0 = arith.constant 0 : i32
    %c0_i32_1 = arith.constant 0 : i32
    return %c0_i32, %c0_i32_0 : i32, i32
  }
  func.func @transform_2(%arg0: i32) -> (i32, i32) {
    %c0_i32 = arith.constant 0 : i32
    %c0_i32_0 = arith.constant 0 : i32
    %c0_i32_1 = arith.constant 0 : i32
    return %c0_i32, %c0_i32_0 : i32, i32
  }
  func.func @transform_3(%arg0: i32) -> (i32, i32) {
    %c0_i32 = arith.constant 0 : i32
    %c0_i32_0 = arith.constant 0 : i32
    return %arg0, %c0_i32 : i32, i32
  }
}

</mosaic_0001>

<bundles_post_ra>
// kernel: tpu_custom_call.1
= control target key start
LH: loop header
LB: loop body
LE: loop exit
PB: predicated region body
PF: predicated region fallthrough
CT: control target
= control target key end

     0   :  { %8 = vsyncpa [#allocation3], 0  ;;  %s1615_s0 = inlined_call_operand.hbm [shape: f32[8,128], index: 0, kind: input, shape index: {}, may-alias: {0,3}]   ;;  %s1616_s1 = inlined_call_operand.hbm [shape: f32[128,128], index: 1, kind: input, shape index: {}]   ;;  %s1617_s2 = inlined_call_operand.vmem [shape: f32[1,128], index: 2, kind: input, shape index: {}]   ;;  %s1618_s3 = inlined_call_operand.hbm [shape: f32[8,128], index: 3, kind: output, shape index: {}, may-alias: {0,3}]  }
   0x1   :  { %9 = vsyncpa [#allocation6], 0 }
   0x2   :  { %10 = vsyncpa [#allocation4], 0  ;;  %s1371_s12 = smov [#allocation2]   ;;  %s1372_s14 = smov [#allocation5]  }
   0x3   :  { %s17_s13 = sshll.u32 %s1371_s12, 4  ;;  %s26_s15 = sshll.u32 %s1372_s14, 4  ;;  %s18_s13 = int_to_ptr.vmem [resolvable:$true] %s17_s13  ;;  %s1399_s15 = int_to_ptr.vmem [resolvable:$true] %s26_s15 }
   0x4   :  { %s1299_s18 = scalar_lea.hbm %s1615_s0, 128 }
   0x5   :  { %p1300_p0 = scmp.ne.s32.totalorder %s1615_s0, %s1299_s18  ;;  %p1303_p1 = scmp.lt.u32.totalorder %s1299_s18, %s1615_s0 }
   0x7   :  { %p1305_p2 = pnand %p1303_p1, %p1300_p0 }
   0x9   :  { %1308 = shalt.err (!%p1305_p2)
}
   0xa   :  { %s1309_s23 = scalar_lea.vmem %s18_s13, 128  ;;  %p1314_p4 = scmp.lt.s32.totalorder %s18_s13, %s18_s13 }
   0xb   :  { %p1310_p3 = scmp.ne.s32.totalorder %s18_s13, %s1309_s23  ;;  %p1315_p5 = scmp.lt.s32.totalorder %s1309_s23, %s1309_s23 }
   0xd   :  { %p1316_p6 = por %p1315_p5, %p1314_p4 }
   0xf   :  { %p1317_p7 = pnand %p1316_p6, %p1310_p3 }
  0x11   :  { %1320 = shalt.err (!%p1317_p7)
}
  0x12   :  { %20 = dma.hbm_to_vmem [thread:$0]  %s1615_s0, 128, %s18_s13, [#allocation3]  }
  0x13   :  { %s1321_s28 = scalar_lea.hbm %s1616_s1, 2048 }
  0x14   :  { %p1322_p8 = scmp.ne.s32.totalorder %s1616_s1, %s1321_s28  ;;  %p1325_p9 = scmp.lt.u32.totalorder %s1321_s28, %s1616_s1 }
  0x16   :  { %p1327_p10 = pnand %p1325_p9, %p1322_p8 }
  0x18   :  { %1330 = shalt.err (!%p1327_p10)
}
  0x19   :  { %s1331_s6 = scalar_lea.vmem %s1399_s15, 2048  ;;  %p1336_p12 = scmp.lt.s32.totalorder %s1399_s15, %s1399_s15 }
  0x1a   :  { %p1332_p11 = scmp.ne.s32.totalorder %s1399_s15, %s1331_s6  ;;  %p1337_p13 = scmp.lt.s32.totalorder %s1331_s6, %s1331_s6 }
  0x1c   :  { %p1338_p0 = por %p1337_p13, %p1336_p12 }
  0x1e   :  { %p1339_p1 = pnand %p1338_p0, %p1332_p11 }
  0x20   :  { %1342 = shalt.err (!%p1339_p1)
}
  0x21   :  { %s1373_s0 = smov 128   ;;  %s1374_s7 = smov 8  }
  0x22   :  { %32 = dma.hbm_to_vmem [thread:$0]  %s1616_s1, 2048, %s1399_s15, [#allocation6], %s1373_s0, %s1373_s0, %s1374_s7  }
  0x23   :  { %1365 = dma.done.wait [#allocation3], 128  }
  0x24   :  { %1366 = vsyncadd [#allocation3], 4294967168 }
  0x25   :  { %1367 = dma.done.wait [#allocation6], 2048  }
  0x26   :  { %1368 = vsyncadd [#allocation6], 4294965248  ;;  %v1375_v0 = vmov 0.0|0.0   ;;  %vm1376_vm0 = vmmov 0   ;;  %v1377_v1 = vmov 0.0   ;;  %v41_v2 = vld [vmem:[#allocation5] sm:$0xff] }
  0x27   :  { %1083 = vmatprep.subr.bf16.mxu0 %v1375_v0  ;;  %835 = vmatprep.mubr.msk.f32.mxu0 %vm1376_vm0, %v1377_v1  ;;  %v42_v3 = vld [vmem:[#allocation5 + $0x8] sm:$0xff]  ;;  %v43_v4 = vld [vmem:[#allocation5 + $0x10] sm:$0xff]  ;;  %v44_v6 = vld [vmem:[#allocation5 + $0x18] sm:$0xff] }
  0x28   :  { %1107 = vmatprep.subr.bf16.mxu1 %v1375_v0  ;;  %870 = vmatprep.mubr.msk.f32.mxu1 %vm1376_vm0, %v1377_v1  ;;  %v1436_v5 = vpack.c.bf16 %v42_v3, %v41_v2  ;;  %v1439_v7 = vpack.c.bf16 %v44_v6, %v43_v4  ;;  %v45_v8 = vld [vmem:[#allocation5 + $0x20] sm:$0xff]  ;;  %v46_v9 = vld [vmem:[#allocation5 + $0x28] sm:$0xff]  ;;  %v47_v11 = vld [vmem:[#allocation5 + $0x30] sm:$0xff] }
  0x29   :  { %v1445_v10 = vpack.c.bf16 %v46_v9, %v45_v8  ;;  %v48_v12 = vld [vmem:[#allocation5 + $0x38] sm:$0xff]  ;;  %v49_v14 = vld [vmem:[#allocation5 + $0x40] sm:$0xff]  ;;  %v50_v15 = vld [vmem:[#allocation5 + $0x48] sm:$0xff] }
  0x2a   :  { %1085 = vmatpush3.bf16.msra.mxu0 %v1436_v5  ;;  %1109 = vmatpush3.bf16.msra.mxu1 %v1436_v5  ;;  %v1451_v13 = vpack.c.bf16 %v48_v12, %v47_v11  ;;  %v1457_v16 = vpack.c.bf16 %v50_v15, %v49_v14  ;;  %v51_v17 = vld [vmem:[#allocation5 + $0x50] sm:$0xff]  ;;  %v52_v18 = vld [vmem:[#allocation5 + $0x58] sm:$0xff]  ;;  %v53_v20 = vld [vmem:[#allocation5 + $0x60] sm:$0xff] }
  0x2b   :  { %1086 = vmatprep.subr.bf16.mxu0 %v1375_v0  ;;  %1110 = vmatprep.subr.bf16.mxu1 %v1375_v0  ;;  %v1463_v19 = vpack.c.bf16 %v52_v18, %v51_v17  ;;  %v54_v21 = vld [vmem:[#allocation5 + $0x68] sm:$0xff]  ;;  %v55_v23 = vld [vmem:[#allocation5 + $0x70] sm:$0xff]  ;;  %v56_v24 = vld [vmem:[#allocation5 + $0x78] sm:$0xff] }
  0x2c   :  { %v1469_v22 = vpack.c.bf16 %v54_v21, %v53_v20  ;;  %v1475_v25 = vpack.c.bf16 %v56_v24, %v55_v23  ;;  %v58_v26 = vld [vmem:[#allocation2] sm:$0xff] }
  0x2d   :  { %v1505_v27 = vld [vmem:[%s1617_s2] ss:$0 sm:$0xff]  ;;  %s1378_s2 = smov [#allocation7]  }
  0x2e   :  { %1088 = vmatpush3.bf16.msra.mxu0 %v1439_v7  ;;  %1112 = vmatpush3.bf16.msra.mxu1 %v1439_v7  ;;  %s656_s11 = sshll.u32 %s1378_s2, 4  ;;  %s657_s11 = int_to_ptr.vmem [resolvable:$true] %s656_s11 }
  0x2f   :  { %1089 = vmatprep.subr.bf16.mxu0 %v1375_v0  ;;  %1113 = vmatprep.subr.bf16.mxu1 %v1375_v0  ;;  %s1343_s12 = scalar_lea.vmem %s657_s11, 128  ;;  %p1348_p3 = scmp.lt.s32.totalorder %s657_s11, %s657_s11 }
  0x30   :  { %p1344_p2 = scmp.ne.s32.totalorder %s657_s11, %s1343_s12  ;;  %p1349_p4 = scmp.lt.s32.totalorder %s1343_s12, %s1343_s12 }
  0x32   :  { %1091 = vmatpush3.bf16.msra.mxu0 %v1445_v10  ;;  %1115 = vmatpush3.bf16.msra.mxu1 %v1445_v10  ;;  %p1350_p5 = por %p1349_p4, %p1348_p3 }
  0x33   :  { %1092 = vmatprep.subr.bf16.mxu0 %v1375_v0  ;;  %1116 = vmatprep.subr.bf16.mxu1 %v1375_v0 }
  0x34   :  { %p1351_p6 = pnand %p1350_p5, %p1344_p2 }
  0x36   :  { %1094 = vmatpush3.bf16.msra.mxu0 %v1451_v13  ;;  %1118 = vmatpush3.bf16.msra.mxu1 %v1451_v13 }
  0x37   :  { %1095 = vmatprep.subr.bf16.mxu0 %v1375_v0  ;;  %1119 = vmatprep.subr.bf16.mxu1 %v1375_v0 }
  0x3a   :  { %1097 = vmatpush3.bf16.msra.mxu0 %v1457_v16  ;;  %1121 = vmatpush3.bf16.msra.mxu1 %v1457_v16 }
  0x3b   :  { %1098 = vmatprep.subr.bf16.mxu0 %v1375_v0  ;;  %1122 = vmatprep.subr.bf16.mxu1 %v1375_v0 }
  0x3e   :  { %1100 = vmatpush3.bf16.msra.mxu0 %v1463_v19  ;;  %1124 = vmatpush3.bf16.msra.mxu1 %v1463_v19 }
  0x3f   :  { %1101 = vmatprep.subr.bf16.mxu0 %v1375_v0  ;;  %1125 = vmatprep.subr.bf16.mxu1 %v1375_v0 }
  0x42   :  { %1103 = vmatpush3.bf16.msra.mxu0 %v1469_v22  ;;  %1127 = vmatpush3.bf16.msra.mxu1 %v1469_v22 }
  0x43   :  { %1104 = vmatprep.subr.bf16.mxu0 %v1375_v0  ;;  %1128 = vmatprep.subr.bf16.mxu1 %v1375_v0 }
  0x46   :  { %1106 = vmatpush3.bf16.msra.mxu0 %v1475_v25  ;;  %1130 = vmatpush3.bf16.msra.mxu1 %v1475_v25 }
  0x47   :  { %1131 = vmatprep.subr.bf16.mxu0 %v1375_v0  ;;  %1155 = vmatprep.subr.bf16.mxu1 %v1375_v0 }
  0x49   :  { %836 = vmatmul.mubr.f32.vlgmr.msra.gmra.mrb[0].mxu0 %v58_v26 }
  0x4a   :  { %1133 = vmatpush3.bf16.msra.mxu0 %v1436_v5  ;;  %905 = vmatprep.mubr.msk.f32.mxu0 %vm1376_vm0, %v1377_v1 }
  0x4b   :  { %1134 = vmatprep.subr.bf16.mxu0 %v1375_v0 }
  0x4e   :  { %1136 = vmatpush3.bf16.msra.mxu0 %v1439_v7 }
  0x4f   :  { %1137 = vmatprep.subr.bf16.mxu0 %v1375_v0 }
  0x52   :  { %1139 = vmatpush3.bf16.msra.mxu0 %v1445_v10 }
  0x53   :  { %1140 = vmatprep.subr.bf16.mxu0 %v1375_v0 }
  0x56   :  { %1142 = vmatpush3.bf16.msra.mxu0 %v1451_v13 }
  0x57   :  { %1143 = vmatprep.subr.bf16.mxu0 %v1375_v0 }
  0x5a   :  { %1145 = vmatpush3.bf16.msra.mxu0 %v1457_v16 }
  0x5b   :  { %1146 = vmatprep.subr.bf16.mxu0 %v1375_v0 }
  0x5e   :  { %1148 = vmatpush3.bf16.msra.mxu0 %v1463_v19 }
  0x5f   :  { %1149 = vmatprep.subr.bf16.mxu0 %v1375_v0 }
  0x62   :  { %1151 = vmatpush3.bf16.msra.mxu0 %v1469_v22 }
  0x63   :  { %1152 = vmatprep.subr.bf16.mxu0 %v1375_v0 }
  0x66   :  { %1154 = vmatpush3.bf16.msra.mxu0 %v1475_v25 }
  0x67   :  { %1179 = vmatprep.subr.bf16.mxu0 %v1375_v0 }
 0x11c   :  { %v131_v28 = vpop.f32.mrb[0].mxu0 }
 0x11d   :  { %v132_v29 = vadd.f32 %v1505_v27, %v131_v28  ;;  %v837_v30 = vpop.f32.mrb[1].mxu0 }
 0x11f   :  { %1283 = vtanh.f32 %v132_v29 }
 0x129   :  { %v1284_v31 = vpop.eup %1283 }
 0x12a   :  { %v136_v32 = vmul.f32 0.125, %v1284_v31 }
 0x12c   :  { %v137_v33 = vadd.f32 %v136_v32, %v58_v26 }
 0x12e   :  { %871 = vmatmul.mubr.f32.vlgmr.msra.gmra.mrb[0].mxu1 %v137_v33 }
 0x12f   :  { %1157 = vmatpush3.bf16.msra.mxu1 %v1436_v5  ;;  %940 = vmatprep.mubr.msk.f32.mxu1 %vm1376_vm0, %v1377_v1 }
 0x130   :  { %1158 = vmatprep.subr.bf16.mxu1 %v1375_v0 }
 0x133   :  { %1160 = vmatpush3.bf16.msra.mxu1 %v1439_v7 }
 0x134   :  { %1161 = vmatprep.subr.bf16.mxu1 %v1375_v0 }
 0x137   :  { %1163 = vmatpush3.bf16.msra.mxu1 %v1445_v10 }
 0x138   :  { %1164 = vmatprep.subr.bf16.mxu1 %v1375_v0 }
 0x13b   :  { %1166 = vmatpush3.bf16.msra.mxu1 %v1451_v13 }
 0x13c   :  { %1167 = vmatprep.subr.bf16.mxu1 %v1375_v0 }
 0x13f   :  { %1169 = vmatpush3.bf16.msra.mxu1 %v1457_v16 }
 0x140   :  { %1170 = vmatprep.subr.bf16.mxu1 %v1375_v0 }
 0x143   :  { %1172 = vmatpush3.bf16.msra.mxu1 %v1463_v19 }
 0x144   :  { %1173 = vmatprep.subr.bf16.mxu1 %v1375_v0 }
 0x147   :  { %1175 = vmatpush3.bf16.msra.mxu1 %v1469_v22 }
 0x148   :  { %1176 = vmatprep.subr.bf16.mxu1 %v1375_v0 }
 0x14b   :  { %1178 = vmatpush3.bf16.msra.mxu1 %v1475_v25 }
 0x14c   :  { %1203 = vmatprep.subr.bf16.mxu1 %v1375_v0 }
 0x201   :  { %v204_v34 = vpop.f32.mrb[0].mxu1 }
 0x202   :  { %v205_v35 = vadd.f32 %v1505_v27, %v204_v34  ;;  %v872_v36 = vpop.f32.mrb[1].mxu1 }
 0x204   :  { %1285 = vtanh.f32 %v205_v35 }
 0x20e   :  { %v1286_v37 = vpop.eup %1285 }
 0x20f   :  { %v209_v38 = vmul.f32 0.125, %v1286_v37 }
 0x211   :  { %v210_v39 = vadd.f32 %v209_v38, %v137_v33 }
 0x213   :  { %906 = vmatmul.mubr.f32.vlgmr.msra.gmra.mrb[2].mxu0 %v210_v39 }
 0x214   :  { %1181 = vmatpush3.bf16.msra.mxu0 %v1436_v5  ;;  %975 = vmatprep.mubr.msk.f32.mxu0 %vm1376_vm0, %v1377_v1 }
 0x215   :  { %1182 = vmatprep.subr.bf16.mxu0 %v1375_v0 }
 0x218   :  { %1184 = vmatpush3.bf16.msra.mxu0 %v1439_v7 }
 0x219   :  { %1185 = vmatprep.subr.bf16.mxu0 %v1375_v0 }
 0x21c   :  { %1187 = vmatpush3.bf16.msra.mxu0 %v1445_v10 }
 0x21d   :  { %1188 = vmatprep.subr.bf16.mxu0 %v1375_v0 }
 0x220   :  { %1190 = vmatpush3.bf16.msra.mxu0 %v1451_v13 }
 0x221   :  { %1191 = vmatprep.subr.bf16.mxu0 %v1375_v0 }
 0x224   :  { %1193 = vmatpush3.bf16.msra.mxu0 %v1457_v16 }
 0x225   :  { %1194 = vmatprep.subr.bf16.mxu0 %v1375_v0 }
 0x228   :  { %1196 = vmatpush3.bf16.msra.mxu0 %v1463_v19 }
 0x229   :  { %1197 = vmatprep.subr.bf16.mxu0 %v1375_v0 }
 0x22c   :  { %1199 = vmatpush3.bf16.msra.mxu0 %v1469_v22 }
 0x22d   :  { %1200 = vmatprep.subr.bf16.mxu0 %v1375_v0 }
 0x230   :  { %1202 = vmatpush3.bf16.msra.mxu0 %v1475_v25 }
 0x231   :  { %1227 = vmatprep.subr.bf16.mxu0 %v1375_v0 }
 0x2e6   :  { %v277_v40 = vpop.f32.mrb[2].mxu0 }
 0x2e7   :  { %v278_v41 = vadd.f32 %v1505_v27, %v277_v40  ;;  %v907_v42 = vpop.f32.mrb[3].mxu0 }
 0x2e9   :  { %1287 = vtanh.f32 %v278_v41 }
 0x2f3   :  { %v1288_v43 = vpop.eup %1287 }
 0x2f4   :  { %v282_v44 = vmul.f32 0.125, %v1288_v43 }
 0x2f6   :  { %v283_v45 = vadd.f32 %v282_v44, %v210_v39 }
 0x2f8   :  { %941 = vmatmul.mubr.f32.vlgmr.msra.gmra.mrb[2].mxu1 %v283_v45 }
 0x2f9   :  { %1205 = vmatpush3.bf16.msra.mxu1 %v1436_v5  ;;  %1010 = vmatprep.mubr.msk.f32.mxu1 %vm1376_vm0, %v1377_v1 }
 0x2fa   :  { %1206 = vmatprep.subr.bf16.mxu1 %v1375_v0 }
 0x2fd   :  { %1208 = vmatpush3.bf16.msra.mxu1 %v1439_v7 }
 0x2fe   :  { %1209 = vmatprep.subr.bf16.mxu1 %v1375_v0 }
 0x301   :  { %1211 = vmatpush3.bf16.msra.mxu1 %v1445_v10 }
 0x302   :  { %1212 = vmatprep.subr.bf16.mxu1 %v1375_v0 }
 0x305   :  { %1214 = vmatpush3.bf16.msra.mxu1 %v1451_v13 }
 0x306   :  { %1215 = vmatprep.subr.bf16.mxu1 %v1375_v0 }
 0x309   :  { %1217 = vmatpush3.bf16.msra.mxu1 %v1457_v16 }
 0x30a   :  { %1218 = vmatprep.subr.bf16.mxu1 %v1375_v0 }
 0x30d   :  { %1220 = vmatpush3.bf16.msra.mxu1 %v1463_v19 }
 0x30e   :  { %1221 = vmatprep.subr.bf16.mxu1 %v1375_v0 }
 0x311   :  { %1223 = vmatpush3.bf16.msra.mxu1 %v1469_v22 }
 0x312   :  { %1224 = vmatprep.subr.bf16.mxu1 %v1375_v0 }
 0x315   :  { %1226 = vmatpush3.bf16.msra.mxu1 %v1475_v25 }
 0x316   :  { %1251 = vmatprep.subr.bf16.mxu1 %v1375_v0 }
 0x3cb   :  { %v350_v46 = vpop.f32.mrb[2].mxu1 }
 0x3cc   :  { %v351_v47 = vadd.f32 %v1505_v27, %v350_v46  ;;  %v942_v48 = vpop.f32.mrb[3].mxu1 }
 0x3ce   :  { %1289 = vtanh.f32 %v351_v47 }
 0x3d8   :  { %v1290_v49 = vpop.eup %1289 }
 0x3d9   :  { %v355_v50 = vmul.f32 0.125, %v1290_v49 }
 0x3db   :  { %v356_v51 = vadd.f32 %v355_v50, %v283_v45 }
 0x3dd   :  { %976 = vmatmul.mubr.f32.vlgmr.msra.gmra.mrb[4].mxu0 %v356_v51 }
 0x3de   :  { %1229 = vmatpush3.bf16.msra.mxu0 %v1436_v5  ;;  %1045 = vmatprep.mubr.msk.f32.mxu0 %vm1376_vm0, %v1377_v1 }
 0x3df   :  { %1230 = vmatprep.subr.bf16.mxu0 %v1375_v0 }
 0x3e2   :  { %1232 = vmatpush3.bf16.msra.mxu0 %v1439_v7 }
 0x3e3   :  { %1233 = vmatprep.subr.bf16.mxu0 %v1375_v0 }
 0x3e6   :  { %1235 = vmatpush3.bf16.msra.mxu0 %v1445_v10 }
 0x3e7   :  { %1236 = vmatprep.subr.bf16.mxu0 %v1375_v0 }
 0x3ea   :  { %1238 = vmatpush3.bf16.msra.mxu0 %v1451_v13 }
 0x3eb   :  { %1239 = vmatprep.subr.bf16.mxu0 %v1375_v0 }
 0x3ee   :  { %1241 = vmatpush3.bf16.msra.mxu0 %v1457_v16 }
 0x3ef   :  { %1242 = vmatprep.subr.bf16.mxu0 %v1375_v0 }
 0x3f2   :  { %1244 = vmatpush3.bf16.msra.mxu0 %v1463_v19 }
 0x3f3   :  { %1245 = vmatprep.subr.bf16.mxu0 %v1375_v0 }
 0x3f6   :  { %1247 = vmatpush3.bf16.msra.mxu0 %v1469_v22 }
 0x3f7   :  { %1248 = vmatprep.subr.bf16.mxu0 %v1375_v0 }
 0x3fa   :  { %1250 = vmatpush3.bf16.msra.mxu0 %v1475_v25 }
 0x4b0   :  { %v423_v52 = vpop.f32.mrb[4].mxu0 }
 0x4b1   :  { %v424_v53 = vadd.f32 %v1505_v27, %v423_v52  ;;  %v977_v54 = vpop.f32.mrb[5].mxu0 }
 0x4b3   :  { %1291 = vtanh.f32 %v424_v53 }
 0x4bd   :  { %v1292_v55 = vpop.eup %1291 }
 0x4be   :  { %v428_v56 = vmul.f32 0.125, %v1292_v55 }
 0x4c0   :  { %v429_v57 = vadd.f32 %v428_v56, %v356_v51 }
 0x4c2   :  { %1011 = vmatmul.mubr.f32.vlgmr.msra.gmra.mrb[4].mxu1 %v429_v57 }
 0x4c3   :  { %1253 = vmatpush3.bf16.msra.mxu1 %v1436_v5  ;;  %1080 = vmatprep.mubr.msk.f32.mxu1 %vm1376_vm0, %v1377_v1 }
 0x4c4   :  { %1254 = vmatprep.subr.bf16.mxu1 %v1375_v0 }
 0x4c7   :  { %1256 = vmatpush3.bf16.msra.mxu1 %v1439_v7 }
 0x4c8   :  { %1257 = vmatprep.subr.bf16.mxu1 %v1375_v0 }
 0x4cb   :  { %1259 = vmatpush3.bf16.msra.mxu1 %v1445_v10 }
 0x4cc   :  { %1260 = vmatprep.subr.bf16.mxu1 %v1375_v0 }
 0x4cf   :  { %1262 = vmatpush3.bf16.msra.mxu1 %v1451_v13 }
 0x4d0   :  { %1263 = vmatprep.subr.bf16.mxu1 %v1375_v0 }
 0x4d3   :  { %1265 = vmatpush3.bf16.msra.mxu1 %v1457_v16 }
 0x4d4   :  { %1266 = vmatprep.subr.bf16.mxu1 %v1375_v0 }
 0x4d7   :  { %1268 = vmatpush3.bf16.msra.mxu1 %v1463_v19 }
 0x4d8   :  { %1269 = vmatprep.subr.bf16.mxu1 %v1375_v0 }
 0x4db   :  { %1271 = vmatpush3.bf16.msra.mxu1 %v1469_v22 }
 0x4dc   :  { %1272 = vmatprep.subr.bf16.mxu1 %v1375_v0 }
 0x4df   :  { %1274 = vmatpush3.bf16.msra.mxu1 %v1475_v25 }
 0x595   :  { %v496_v58 = vpop.f32.mrb[4].mxu1 }
 0x596   :  { %v497_v59 = vadd.f32 %v1505_v27, %v496_v58  ;;  %v1012_v60 = vpop.f32.mrb[5].mxu1 }
 0x598   :  { %1293 = vtanh.f32 %v497_v59 }
 0x5a2   :  { %v1294_v61 = vpop.eup %1293 }
 0x5a3   :  { %v501_v62 = vmul.f32 0.125, %v1294_v61 }
 0x5a5   :  { %v502_v63 = vadd.f32 %v501_v62, %v429_v57 }
 0x5a7   :  { %1046 = vmatmul.mubr.f32.vlgmr.msra.gmra.mrb[6].mxu0 %v502_v63 }
 0x67a   :  { %v569_v1 = vpop.f32.mrb[6].mxu0 }
 0x67b   :  { %v570_v2 = vadd.f32 %v1505_v27, %v569_v1  ;;  %v1047_v3 = vpop.f32.mrb[7].mxu0 }
 0x67d   :  { %1295 = vtanh.f32 %v570_v2 }
 0x687   :  { %v1296_v4 = vpop.eup %1295 }
 0x688   :  { %v574_v5 = vmul.f32 0.125, %v1296_v4 }
 0x68a   :  { %v575_v6 = vadd.f32 %v574_v5, %v502_v63 }
 0x68c   :  { %1081 = vmatmul.mubr.f32.vlgmr.msra.gmra.mrb[6].mxu1 %v575_v6 }
 0x75f   :  { %v642_v0 = vpop.f32.mrb[6].mxu1 }
 0x760   :  { %v643_v7 = vadd.f32 %v1505_v27, %v642_v0  ;;  %v1082_v8 = vpop.f32.mrb[7].mxu1 }
 0x762   :  { %1297 = vtanh.f32 %v643_v7 }
 0x76c   :  { %v1298_v9 = vpop.eup %1297 }
 0x76d   :  { %v647_v10 = vmul.f32 0.125, %v1298_v9 }
 0x76f   :  { %v648_v11 = vadd.f32 %v647_v10, %v575_v6 }
 0x771   :  { %649 = vst [vmem:[#allocation7] sm:$0xff] %v648_v11 }
 0x772   :  { %1354 = shalt.err (!%p1351_p6)
}
 0x773   :  { %s1355_s15 = scalar_lea.hbm %s1618_s3, 128 }
 0x774   :  { %p1356_p7 = scmp.ne.s32.totalorder %s1618_s3, %s1355_s15  ;;  %p1359_p8 = scmp.lt.u32.totalorder %s1355_s15, %s1618_s3 }
 0x776   :  { %p1361_p9 = pnand %p1359_p8, %p1356_p7 }
 0x778   :  { %1364 = shalt.err (!%p1361_p9)
}
 0x779   :  { %659 = dma.vmem_to_hbm [thread:$0]  %s657_s11, 128, %s1618_s3, [#allocation4]  }
 0x77a   :  { %1369 = dma.done.wait [#allocation4], 128  }
 0x77b   :  { %1370 = vsyncadd [#allocation4], 4294967168 }
 0x77c   :  { %663 = vsyncpa [#allocation3], 1 }
 0x77d   :  { %664 = vsyncpa [#allocation6], 1 }
 0x77e   :  { %665 = vsyncpa [#allocation4], 1 }

</bundles_post_ra>
